<compile_context>
chip_gen: v6e
topology: v6e:2x2x1
jax: 0.10.0
libtpu: 0.0.40
codegen_flags: <defaults>
</compile_context>

<pallas_src>
import jax
import jax.numpy as jnp
import numpy as np
from jax.experimental import pallas as pl
from jax.experimental.pallas import tpu as pltpu


def calculate_prior(num_classes, img_max=100.0, prior_exp=0.1):
    """Deterministic long-tailed class-count profile (LADE-style exponential decay)."""
    img_num_per_cls = []
    for cls_idx in range(num_classes):
        num = img_max * (prior_exp ** (cls_idx / (num_classes - 1.0)))
        img_num_per_cls.append(int(num))
    return np.asarray(img_num_per_cls, dtype=np.float32)


def prior_ce_kernel(x_ref, logp_ref, y_ref, logpy_ref, loss_ref):
    # x_ref:     (TM, C) native dtype (bf16/f32)  VMEM  -- one batch tile (C = full class dim)
    # logp_ref:  (1,  C) f32                      VMEM  -- log(prior + 1e-9), resident
    # y_ref:     (TM, 1) i32                      VMEM  -- target class per row
    # logpy_ref: (TM, 1) f32                      VMEM  -- log(prior + 1e-9)[y], pre-gathered
    # loss_ref:  (TM, 1) f32                      VMEM  -- per-row CE loss
    x = x_ref[...]                                   # native dtype: bf16 sweeps on v6e/v7x
    logp = logp_ref[...]                             # (1, C) f32

    # Row stabilizer: upper bound max_j(x+logp) <= max_j(x) + max_j(logp).  LSE is exact
    # for any m; this keeps the big max reduction on the native (possibly bf16) tile.
    m = (jnp.max(x, axis=-1, keepdims=True).astype(jnp.float32)
         + jnp.max(logp, axis=-1, keepdims=True))    # (TM, 1) f32

    # Single f32 sweep: logits, exp, row-sum (ragged lanes masked by Mosaic).
    logits = x.astype(jnp.float32) + logp            # (TM, C) f32
    s = jnp.sum(jnp.exp(logits - m), axis=-1, keepdims=True)
    lse = m + jnp.log(s)                             # (TM, 1) f32

    # Target logit = x[i, y[i]] + logp[y[i]].  The x part is gathered with a
    # compare+select+lane-reduce on the NATIVE-dtype tile (exact: one nonzero term);
    # the logp part arrives pre-gathered per row, so the gather never re-reads the
    # f32 logits temp.
    col = jax.lax.broadcasted_iota(jnp.int32, x.shape, 1)       # (TM, C)
    onehot = col == y_ref[...]                                  # (TM, C) bool
    tgt_x = jnp.sum(jnp.where(onehot, x, jnp.zeros_like(x)),
                    axis=-1, keepdims=True).astype(jnp.float32)  # (TM, 1)

    loss_ref[...] = lse - (tgt_x + logpy_ref[...])


def prior_ce_loss(x, y, log_prior, *, tm=None):
    """Mean cross-entropy of (x + log_prior) vs integer targets y. x: (N, C), y: (N,)."""
    n, c = x.shape
    itemsize = x.dtype.itemsize

    logp = log_prior.reshape(1, c).astype(jnp.float32)
    y = y.astype(jnp.int32)
    logpy = jnp.take(logp[0], y, axis=0).reshape(n, 1)   # tiny (N,) gather in XLA
    y2d = y.reshape(n, 1)

    # --- tile sizing ------------------------------------------------------------------
    sub = max(8, 32 // itemsize)                 # sublane packing: 8 f32 / 16 bf16 / 32 int8
    cp_phys = pl.cdiv(c, 128) * 128              # physical lane footprint of one row
    # Budget against the f32 intermediates: working set ~ 2*x_tile (dbl-buffered, <= B)
    # + ~3 f32 temps (3*B) ~= 5*B; B = 2 MiB keeps us ~10 MiB (< v5e 16 MiB scoped
    # default, comfortable on v7x 64 MiB physical).
    tile_bytes = 2 * 1024 * 1024
    tm_cap = max(sub, ((tile_bytes // (cp_phys * 4)) // sub) * sub)
    tm = tm_cap if tm is None else max(sub, (min(tm, tm_cap) // sub) * sub)
    tm = min(tm, max(sub, pl.cdiv(n, sub) * sub))          # don't overrun tiny batches
    if n > sub:                                            # megacore: aim for >= 4 blocks
        tm = min(tm, max(sub, pl.cdiv(pl.cdiv(n, 4), sub) * sub))
    num_blocks = pl.cdiv(n, tm)                            # ragged grid: no batch padding

    cost = pl.CostEstimate(
        flops=7 * n * c,
        transcendentals=n * c,
        bytes_accessed=n * c * itemsize + 3 * n * 4 + c * 4,
    )

    per_row = pl.pallas_call(
        prior_ce_kernel,
        out_shape=jax.ShapeDtypeStruct((n, 1), jnp.float32),
        grid=(num_blocks,),
        in_specs=[
            pl.BlockSpec((tm, c), lambda i: (i, 0)),    # x tile (full class dim per block)
            pl.BlockSpec((1, c), lambda i: (0, 0)),     # log-prior, resident across grid
            pl.BlockSpec((tm, 1), lambda i: (i, 0)),    # targets
            pl.BlockSpec((tm, 1), lambda i: (i, 0)),    # log-prior gathered at targets
        ],
        out_specs=pl.BlockSpec((tm, 1), lambda i: (i, 0)),
        compiler_params=pltpu.CompilerParams(
            dimension_semantics=("parallel",),          # no cross-step state -> megacore OK
        ),
        cost_estimate=cost,
    )(x, logp, y2d, logpy)

    return jnp.sum(per_row[:, 0]) / jnp.float32(n)


if __name__ == "__main__":
    num_classes = 32
    batch = 20   # not a tile multiple -> exercises the ragged (OOB-tail) grid + multi-block

    # Deterministic "parameters" from the module __init__
    img_num_per_cls = calculate_prior(num_classes, img_max=100.0, prior_exp=0.1)
    prior = img_num_per_cls / img_num_per_cls.sum()
    log_prior = jnp.asarray(np.log(prior + 1e-9), dtype=jnp.float32)

    # Deterministic example inputs
    key = jax.random.PRNGKey(0)
    kx, ky = jax.random.split(key)
    x = jax.random.normal(kx, (batch, num_classes), dtype=jnp.float32)
    y = jax.random.randint(ky, (batch,), 0, num_classes, dtype=jnp.int32)

    # Kernel (f32 input; auto tile sizing yields a multi-block ragged grid)
    loss = prior_ce_loss(x, y, log_prior)
    jax.block_until_ready(loss)

    # Pure-JAX reference
    logits_ref = x + log_prior[None, :]
    lse = jax.nn.logsumexp(logits_ref, axis=-1)
    tgt = jnp.take_along_axis(logits_ref, y[:, None], axis=-1)[:, 0]
    loss_ref = jnp.mean(lse - tgt)
    assert jnp.allclose(loss, loss_ref, atol=1e-5, rtol=1e-5), (loss, loss_ref)

    # bf16-over-HBM path (native-dtype max / gather sweeps inside the kernel)
    x_bf16 = x.astype(jnp.bfloat16)
    loss_bf16 = prior_ce_loss(x_bf16, y, log_prior)
    jax.block_until_ready(loss_bf16)
    logits_bf = x_bf16.astype(jnp.float32) + log_prior[None, :]
    lse_bf = jax.nn.logsumexp(logits_bf, axis=-1)
    tgt_bf = jnp.take_along_axis(logits_bf, y[:, None], axis=-1)[:, 0]
    loss_bf_ref = jnp.mean(lse_bf - tgt_bf)
    assert jnp.allclose(loss_bf16, loss_bf_ref, atol=1e-5, rtol=1e-5), (loss_bf16, loss_bf_ref)

    print("KERNEL_OK")
</pallas_src>

<mosaic_0001>
module attributes {stable_mosaic.version = 11 : i64} {
  func.func @prior_ce_kernel(%arg0: i32, %arg1: memref<8x32xf32, #tpu.memory_space<vmem>>, %arg2: memref<1x32xf32, #tpu.memory_space<vmem>>, %arg3: memref<8x1xi32, #tpu.memory_space<vmem>>, %arg4: memref<8x1xf32, #tpu.memory_space<vmem>>, %arg5: memref<8x1xf32, #tpu.memory_space<vmem>>) attributes {dimension_semantics = [#tpu.dimension_semantics<parallel>], iteration_bounds = array<i64: 3>, scalar_prefetch = 0 : i64, scratch_operands = 0 : i64, tpu.core_type = #tpu.core_type<tc>, window_params = [{transform_indices = @transform_0, window_bounds = array<i64: 8, 32>}, {pipeline_mode = #tpu.pipeline_mode<synchronous>, transform_indices = @transform_1, window_bounds = array<i64: 1, 32>}, {transform_indices = @transform_2, window_bounds = array<i64: 8, 1>}, {transform_indices = @transform_3, window_bounds = array<i64: 8, 1>}, {transform_indices = @transform_4, window_bounds = array<i64: 8, 1>}]} {
    %c0 = arith.constant 0 : index
    %c0_0 = arith.constant 0 : index
    %0 = vector.load %arg1[%c0, %c0_0] : memref<8x32xf32, #tpu.memory_space<vmem>>, vector<8x32xf32>
    %c0_1 = arith.constant 0 : index
    %c0_2 = arith.constant 0 : index
    %1 = vector.load %arg2[%c0_1, %c0_2] : memref<1x32xf32, #tpu.memory_space<vmem>>, vector<1x32xf32>
    %cst = arith.constant dense<0xFF800000> : vector<8xf32>
    %2 = vector.multi_reduction <maximumf>, %0, %cst [1] : vector<8x32xf32> to vector<8xf32>
    %3 = vector.shape_cast %2 : vector<8xf32> to vector<8x1xf32>
    %cst_3 = arith.constant dense<0xFF800000> : vector<1xf32>
    %4 = vector.multi_reduction <maximumf>, %1, %cst_3 [1] : vector<1x32xf32> to vector<1xf32>
    %5 = vector.shape_cast %4 : vector<1xf32> to vector<1x1xf32>
    %6 = vector.broadcast %5 : vector<1x1xf32> to vector<8x1xf32>
    %7 = arith.addf %3, %6 : vector<8x1xf32>
    %8 = vector.broadcast %1 : vector<1x32xf32> to vector<8x32xf32>
    %9 = arith.addf %0, %8 : vector<8x32xf32>
    %10 = vector.broadcast %7 : vector<8x1xf32> to vector<8x32xf32>
    %11 = arith.subf %9, %10 : vector<8x32xf32>
    %12 = math.exp %11 : vector<8x32xf32>
    %cst_4 = arith.constant dense<0.000000e+00> : vector<8xf32>
    %13 = vector.multi_reduction <add>, %12, %cst_4 [1] : vector<8x32xf32> to vector<8xf32>
    %14 = vector.shape_cast %13 : vector<8xf32> to vector<8x1xf32>
    %15 = math.log %14 : vector<8x1xf32>
    %16 = arith.addf %7, %15 : vector<8x1xf32>
    %17 = tpu.iota {dimensions = array<i32: 1>} : vector<8x32xi32>
    %c0_5 = arith.constant 0 : index
    %c0_6 = arith.constant 0 : index
    %18 = vector.load %arg3[%c0_5, %c0_6] : memref<8x1xi32, #tpu.memory_space<vmem>>, vector<8x1xi32>
    %19 = vector.broadcast %18 : vector<8x1xi32> to vector<8x32xi32>
    %20 = arith.cmpi eq, %17, %19 : vector<8x32xi32>
    %cst_7 = arith.constant 0.000000e+00 : f32
    %21 = vector.broadcast %cst_7 : f32 to vector<8x32xf32>
    %22 = arith.select %20, %0, %21 : vector<8x32xi1>, vector<8x32xf32>
    %cst_8 = arith.constant dense<0.000000e+00> : vector<8xf32>
    %23 = vector.multi_reduction <add>, %22, %cst_8 [1] : vector<8x32xf32> to vector<8xf32>
    %24 = vector.shape_cast %23 : vector<8xf32> to vector<8x1xf32>
    %c0_9 = arith.constant 0 : index
    %c0_10 = arith.constant 0 : index
    %25 = vector.load %arg4[%c0_9, %c0_10] : memref<8x1xf32, #tpu.memory_space<vmem>>, vector<8x1xf32>
    %26 = arith.addf %24, %25 : vector<8x1xf32>
    %27 = arith.subf %16, %26 : vector<8x1xf32>
    %c0_11 = arith.constant 0 : index
    %c0_12 = arith.constant 0 : index
    %28 = vector.load %arg5[%c0_11, %c0_12] : memref<8x1xf32, #tpu.memory_space<vmem>>, vector<8x1xf32>
    tpu.vector_store %arg5[%c0_11, %c0_12], %27 {strides = array<i32>} : memref<8x1xf32, #tpu.memory_space<vmem>>, vector<8x1xf32>,
    return
  }
  func.func @transform_0(%arg0: i32) -> (i32, i32) {
    %c0_i32 = arith.constant 0 : i32
    %c0_i32_0 = arith.constant 0 : i32
    return %arg0, %c0_i32 : i32, i32
  }
  func.func @transform_1(%arg0: i32) -> (i32, i32) {
    %c0_i32 = arith.constant 0 : i32
    %c0_i32_0 = arith.constant 0 : i32
    %c0_i32_1 = arith.constant 0 : i32
    return %c0_i32, %c0_i32_0 : i32, i32
  }
  func.func @transform_2(%arg0: i32) -> (i32, i32) {
    %c0_i32 = arith.constant 0 : i32
    %c0_i32_0 = arith.constant 0 : i32
    return %arg0, %c0_i32 : i32, i32
  }
  func.func @transform_3(%arg0: i32) -> (i32, i32) {
    %c0_i32 = arith.constant 0 : i32
    %c0_i32_0 = arith.constant 0 : i32
    return %arg0, %c0_i32 : i32, i32
  }
  func.func @transform_4(%arg0: i32) -> (i32, i32) {
    %c0_i32 = arith.constant 0 : i32
    %c0_i32_0 = arith.constant 0 : i32
    return %arg0, %c0_i32 : i32, i32
  }
}

</mosaic_0001>

<bundles_post_ra>
// kernel: tpu_custom_call.1
= control target key start
LH: loop header
LB: loop body
LE: loop exit
PB: predicated region body
PF: predicated region fallthrough
CT: control target
= control target key end

     0   :  { %s411_s15 = smov 0   ;;  %s446_s0 = inlined_call_operand.vmem [shape: f32[20,32], index: 0, kind: input, shape index: {}]   ;;  %s447_s1 = inlined_call_operand.vmem [shape: f32[1,32], index: 1, kind: input, shape index: {}]   ;;  %s448_s2 = inlined_call_operand.vmem [shape: s32[20,1], index: 2, kind: input, shape index: {}]   ;;  %s449_s3 = inlined_call_operand.vmem [shape: f32[20,1], index: 3, kind: input, shape index: {}]   ;;  %s450_s4 = inlined_call_operand.vmem [shape: f32[20,1], index: 4, kind: output, shape index: {}]  }
   0x1 LB: > { %s351_s16 = sadd.s32 4294967295, %s383_s15   ;;  %p355_p0 = scmp.ge.s32.totalorder %s383_s15, 1  ;;  %s383_s15 = sphi %s411_s15, %s14_s15  }
   0x2   : > { %p179_p1 = scmp.lt.s32.totalorder %s383_s15, 4 }
   0x4   : > { %p180_p2 = pnand %p355_p0, %p179_p1 }
   0x5   : > { %p211_p3 = scmp.lt.s32.totalorder (!%p180_p2), %s351_s16, 2 }
   0x6   : > { %183 = sbr.rel (%p180_p2) target bundleno = 335 (0x14f), region = 36 }
   0xb   : > { %v228_v0 = vld [vmem:[%s447_s1] sm:$0x1]  ;;  %vm233_vm0 = vcmask 253952   ;;  %v385_v2 = vmov 0   ;;  %s452_s16 = smov (!%p211_p3, %s351_s16), 2  ;;  %vm229_vm1 = vcmask 261120   ;;  %v237_v6 = vlaneseq }
   0xc   : > { %v234_v1 = vsel %vm233_vm0, %v228_v0, -inf  ;;  %371 = vset.pattern.permute.xlu1 %v385_v2  ;;  %372 = vset.pattern.permute.xlu0 %v385_v2  ;;  %s422_s19 = sshll.u32 %s452_s16, 3  ;;  %vm272_vm3 = vcmask 7168  }
   0xd   : > { %235 = vmax.xlane.f32.xlu0 %v234_v1  ;;  %s214_s22 = scalar_lea.vmem %s446_s0, %s422_s19  ;;  %s218_s25 = scalar_lea.vmem %s448_s2, %s422_s19  ;;  %v259_v7 = vand.u32 127, %v237_v6  ;;  %v238_v11 = vshrl.u32 %v237_v6, 7 }
   0xe   : > { %v227_v3 = vld [vmem:[%s214_s22] sm:$0xff]  ;;  %s222_s28 = scalar_lea.vmem %s449_s3, %s422_s19  ;;  %s226_s5 = scalar_lea.vmem %s450_s4, %s422_s19 }
   0xf   : > { %v260_v4 = vld [vmem:[%s218_s25] sm:$0xff]  ;;  %v230_v5 = vsel %vm229_vm1, %v227_v3, -inf  ;;  %v239_v12 = vsub.s32 0, %v238_v11 }
  0x10   : > { %262 = vperm.xlu1 %371, %v260_v4   ;;  %v269_v24 = vld [vmem:[%s222_s28] sm:$0xff] }
  0x11   : > { %231 = vmax.xlane.f32.xlu0 %v230_v5  ;;  %v246_v14 = vrot.slane %v228_v0, %v239_v12 }
  0x13   : > { %v248_v16 = vadd.f32 %v246_v14, %v227_v3 }
  0x8b   : > { %v263_v8 = vpop.permute.xlu1 %262 }
  0x8c   : > { %vm264_vm2 = vcmp.eq.s32.totalorder %v259_v7, %v263_v8 }
  0x8d   : > { %v265_v9 = vsel %vm264_vm2, %v227_v3, 0.0 }
  0x8e   : > { %v266_v10 = vsel %vm229_vm1, %v265_v9, 0.0 }
  0x8f   : > { %267 = vadd.xlane.f32.xlu0 %v266_v10 }
  0x96   : > { %v236_v13 = vpop.xlane.xlu0 %235 }
  0x97   : > { %v240_v15 = vrot.slane %v236_v13, %v239_v12 }
  0x9a   : > { %v232_v17 = vpop.xlane.xlu0 %231 }
  0x9b   : > { %v241_v18 = vadd.f32 %v240_v15, %v232_v17 }
  0x9d   : > { %v249_v19 = vsub.f32 %v248_v16, %v241_v18 }
  0x9f   : > { %v250_v20 = vmul.f32 1.442695, %v249_v19 }
  0xa1   : > { %373 = vpow2.f32 %v250_v20 }
  0xae   : > { %v374_v21 = vpop.eup %373 }
  0xaf   : > { %v252_v22 = vsel %vm229_vm1, %v374_v21, 0.0 }
  0xb0   : > { %253 = vadd.xlane.f32.xlu1 %v252_v22 }
 0x118   : > { %v268_v25 = vpop.xlane.xlu0 %267 }
 0x119   : > { %v270_v28 = vadd.f32 %v269_v24, %v268_v25 }
 0x139   : > { %v254_v23 = vpop.xlane.xlu1 %253 }
 0x13a   : > { %375 = vlog2.f32 %v254_v23 }
 0x147   : > { %v376_v26 = vpop.eup %375 }
 0x148   : > { %v256_v27 = vmul.f32 0.6931472, %v376_v26 }
 0x14a   : > { %v257_v29 = vadd.f32 %v256_v27, %v241_v18 }
 0x14c   : > { %v271_v30 = vsub.f32 %v257_v29, %v270_v28 }
 0x14e   : > { %273 = vst.msk [vmem:[%s226_s5] sm:$0xff] %vm272_vm3, %v271_v30 }
 0x14f PF: > { %s14_s15 = sadd.s32 1, %s383_s15  }
 0x150   : > { %p11_p4 = scmp.ge.s32.totalorder %s14_s15, 5  }
 0x152   :  { %13 = sbr.rel (!%p11_p4) target bundleno = 1 (0x1), region = 72 }

</bundles_post_ra>
